<compile_context>
chip_gen: v7x
topology: tpu7x:2x2x1
jax: 0.10.0
libtpu: 0.0.40
codegen_flags: <defaults>
</compile_context>

<pallas_src>
import functools

import jax
import jax.numpy as jnp
import numpy as np
from jax.experimental import pallas as pl
from jax.experimental.pallas import tpu as pltpu

_KRON_WEIGHT_LIMIT = 4 * 1024 * 1024   # bytes of the fused (H*W, HO*WO) weight
_KRON_ROW_LIMIT = 1 * 1024 * 1024      # bytes of one flattened input row (H*W)
_VMEM_LIMIT = 32 * 1024 * 1024


def _compiler_params():
    return pltpu.CompilerParams(dimension_semantics=("parallel",),
                                vmem_limit_bytes=_VMEM_LIMIT)


# --------------------------------------------------------------------------
# Kernels
# --------------------------------------------------------------------------
def _avg_kron_kernel(x_ref, w_ref, o_ref):
    # x_ref: (rb, H*W)   w_ref: (H*W, HO*WO)   o_ref: (rb, HO*WO)
    xv = x_ref[...]
    if xv.dtype != jnp.float32:
        xv = xv.astype(jnp.float32)
    o_ref[...] = jnp.dot(xv, w_ref[...],
                         preferred_element_type=jnp.float32).astype(o_ref.dtype)


def _avg_sep_kernel(x_ref, rw_ref, lh_ref, o_ref):
    # x_ref: (rb, Hp, W)   rw_ref: (W, WO)   lh_ref: (HO, Hp)   o_ref: (rb, HO, WO)
    rb, Hp, W = x_ref.shape
    WO = rw_ref.shape[1]
    xv = x_ref[...]
    if xv.dtype != jnp.float32:
        xv = xv.astype(jnp.float32)
    # One batched lane-dense matmul for the W reduction (rb*Hp rows at once).
    y = jnp.dot(xv.reshape(rb * Hp, W), rw_ref[...],
                preferred_element_type=jnp.float32)
    y = y.reshape(rb, Hp, WO)
    lh = lh_ref[...]
    planes = [jnp.dot(lh, y[i], preferred_element_type=jnp.float32)[None]
              for i in range(rb)]
    o_ref[...] = jnp.concatenate(planes, axis=0).astype(o_ref.dtype)


def _max_pool_kernel(x_ref, selw_ref, o_ref, *, kh, kw, sh, dh, ho_pad):
    # x_ref:    (rb, Hp, Wp)  padded with the dtype's finite lowest
    # selw_ref: (kw, Wp, WO)  one-hot column selectors per W tap
    # o_ref:    (rb, HO, WO)
    rb, _, Wp = x_ref.shape
    HO, WO = o_ref.shape[1], o_ref.shape[2]

    def h_tap(t):
        if sh == 1:
            sl = pl.ds(t * dh, ho_pad)
        else:
            sl = pl.ds(t * dh, ho_pad, stride=sh)   # sublane-strided tap read
        return x_ref[:, sl, :].astype(jnp.float32)

    hmax = h_tap(0)
    for t in range(1, kh):
        hmax = jnp.maximum(hmax, h_tap(t))          # VPU max over H taps

    # W dim: one-hot selection matmuls batched over all rb*ho_pad rows.
    h2 = hmax.reshape(rb * ho_pad, Wp)              # ho_pad % 8 == 0 -> free merge
    out = jnp.dot(h2, selw_ref[0], preferred_element_type=jnp.float32)
    for t in range(1, kw):
        out = jnp.maximum(out, jnp.dot(h2, selw_ref[t],
                                       preferred_element_type=jnp.float32))
    out = out.reshape(rb, ho_pad, WO)
    o_ref[...] = out[:, :HO, :].astype(o_ref.dtype)


def _adaptive_max_kernel(x_ref, selw_ref, o_ref, *, kw, h_windows):
    # x_ref: (rb, Hpad, W)   selw_ref: (kw, W, WO)   o_ref: (rb, HO, WO)
    rb, Hpad, W = x_ref.shape
    WO = o_ref.shape[2]
    xv = x_ref[...].astype(jnp.float32)
    x2 = xv.reshape(rb * Hpad, W)                   # Hpad % 8 == 0 -> free merge
    wmax = jnp.dot(x2, selw_ref[0], preferred_element_type=jnp.float32)
    for t in range(1, kw):
        wmax = jnp.maximum(wmax, jnp.dot(x2, selw_ref[t],
                                         preferred_element_type=jnp.float32))
    wmax = wmax.reshape(rb, Hpad, WO)
    rows = [jnp.max(wmax[:, hs:he, :], axis=1, keepdims=True)
            for (hs, he) in h_windows]
    o_ref[...] = jnp.concatenate(rows, axis=1).astype(o_ref.dtype)


# --------------------------------------------------------------------------
# Host-side helpers
# --------------------------------------------------------------------------
def _pair(v):
    if isinstance(v, (tuple, list)):
        return int(v[0]), int(v[1])
    return int(v), int(v)


def _round_up(a, b):
    return -(-a // b) * b


def _lowest(dtype):
    dtype = jnp.dtype(dtype)
    if jnp.issubdtype(dtype, jnp.floating):
        return float(jnp.finfo(dtype).min)
    return int(jnp.iinfo(dtype).min)


def _pool_out_size(L, k, s, p, d, ceil_mode):
    eff = d * (k - 1) + 1
    num = L + 2 * p - eff
    if ceil_mode:
        o = -(-num // s) + 1
        if (o - 1) * s >= L + p:     # last window must start inside input+padding
            o -= 1
    else:
        o = num // s + 1
    return max(int(o), 0)


def _pick_rows(nrows, row_bytes, target_bytes=2 * 1024 * 1024):
    rb = max(1, int(target_bytes) // max(int(row_bytes), 1))
    if rb >= nrows:
        return nrows
    rb = max(8, (rb // 8) * 8)       # keep the 2nd-minor block dim 8-aligned
    return min(rb, nrows)


def _avg_axis_weights(L, K, S, P, O, count_include_pad):
    m = np.zeros((O, L), np.float32)
    for o in range(O):
        start = o * S - P
        end = start + K
        size_inc = min(end, L + P) - start
        vs, ve = max(start, 0), min(end, L)
        div = size_inc if count_include_pad else max(ve - vs, 1)
        if ve > vs:
            m[o, vs:ve] = 1.0 / max(div, 1)
    return m


def _adaptive_axis_weights(L, O):
    m = np.zeros((O, L), np.float32)
    for o in range(O):
        a = (o * L) // O
        b = -(-((o + 1) * L) // O)
        m[o, a:b] = 1.0 / (b - a)
    return m


def _kron_weight(ah, aw):
    # ah: (HO, H), aw: (WO, W)  ->  K[h*W+w, o*WO+p] = ah[o,h]*aw[p,w]
    HO, H = ah.shape
    WO, W = aw.shape
    k = np.einsum('oh,pw->hwop', ah, aw).reshape(H * W, HO * WO)
    return jnp.asarray(np.ascontiguousarray(k))


def _max_selw(Wp, WO, kw, sw, dw):
    sel = np.zeros((kw, Wp, WO), np.float32)
    for t in range(kw):
        for o in range(WO):
            sel[t, o * sw + t * dw, o] = 1.0
    return jnp.asarray(sel)


def _adaptive_windows(L, O):
    return tuple(((o * L) // O, -(-((o + 1) * L) // O)) for o in range(O))


def _adaptive_selw(W, WO):
    wins = _adaptive_windows(W, WO)
    kw = max(e - s for s, e in wins)
    sel = np.zeros((kw, W, WO), np.float32)
    for t in range(kw):
        for o, (s, e) in enumerate(wins):
            sel[t, min(s + t, e - 1), o] = 1.0     # clamp = repeat last (max-safe)
    return jnp.asarray(sel), kw


def _out_hw_from_output_size(output_size, H, W):
    if isinstance(output_size, (tuple, list)):
        ho, wo = output_size
    else:
        ho = wo = output_size
    ho = H if ho is None else int(ho)
    wo = W if wo is None else int(wo)
    return ho, wo


# --------------------------------------------------------------------------
# pallas_call drivers
# --------------------------------------------------------------------------
def _run_kron(xf, wk, out_dtype):
    R, HW = xf.shape
    OW = wk.shape[1]
    rb = _pick_rows(R, HW * jnp.dtype(xf.dtype).itemsize)
    Rp = _round_up(R, rb)
    if Rp != R:
        xf = jnp.pad(xf, ((0, Rp - R), (0, 0)))
    out = pl.pallas_call(
        _avg_kron_kernel,
        out_shape=jax.ShapeDtypeStruct((Rp, OW), out_dtype),
        grid=(Rp // rb,),
        in_specs=[pl.BlockSpec((rb, HW), lambda i: (i, 0)),
                  pl.BlockSpec((HW, OW), lambda i: (0, 0))],      # VMEM-resident
        out_specs=pl.BlockSpec((rb, OW), lambda i: (i, 0)),
        compiler_params=_compiler_params(),
    )(xf, wk)
    return out[:R] if Rp != R else out


def _run_sep(x3, rw, lh, out_dtype, HO, WO):
    R, H, W = x3.shape
    Hpad = _round_up(H, 8)
    rb = min(_pick_rows(R, Hpad * W * jnp.dtype(x3.dtype).itemsize), 32)
    Rp = _round_up(R, rb)
    if Rp != R or Hpad != H:
        x3 = jnp.pad(x3, ((0, Rp - R), (0, Hpad - H), (0, 0)))
    if Hpad != H:
        lh = jnp.pad(lh, ((0, 0), (0, Hpad - H)))
    out = pl.pallas_call(
        _avg_sep_kernel,
        out_shape=jax.ShapeDtypeStruct((Rp, HO, WO), out_dtype),
        grid=(Rp // rb,),
        in_specs=[pl.BlockSpec((rb, Hpad, W), lambda i: (i, 0, 0)),
                  pl.BlockSpec((W, WO), lambda i: (0, 0)),
                  pl.BlockSpec((HO, Hpad), lambda i: (0, 0))],
        out_specs=pl.BlockSpec((rb, HO, WO), lambda i: (i, 0, 0)),
        compiler_params=_compiler_params(),
    )(x3, rw, lh)
    return out[:R] if Rp != R else out


def _run_max(x3, selw, out_dtype, HO, WO, kh, kw, sh, dh, ho_pad):
    R, Hp, Wp = x3.shape
    rb = _pick_rows(R, Hp * Wp * jnp.dtype(x3.dtype).itemsize)
    Rp = _round_up(R, rb)
    if Rp != R:
        x3 = jnp.pad(x3, ((0, Rp - R), (0, 0), (0, 0)),
                     constant_values=_lowest(x3.dtype))
    kern = functools.partial(_max_pool_kernel, kh=kh, kw=kw, sh=sh, dh=dh,
                             ho_pad=ho_pad)
    out = pl.pallas_call(
        kern,
        out_shape=jax.ShapeDtypeStruct((Rp, HO, WO), out_dtype),
        grid=(Rp // rb,),
        in_specs=[pl.BlockSpec((rb, Hp, Wp), lambda i: (i, 0, 0)),
                  pl.BlockSpec((kw, Wp, WO), lambda i: (0, 0, 0))],   # resident
        out_specs=pl.BlockSpec((rb, HO, WO), lambda i: (i, 0, 0)),
        compiler_params=_compiler_params(),
    )(x3, selw)
    return out[:R] if Rp != R else out


def _run_adaptive_max(x3, selw, out_dtype, HO, WO, kw, h_windows):
    R, H, W = x3.shape
    Hpad = _round_up(H, 8)
    rb = _pick_rows(R, Hpad * W * jnp.dtype(x3.dtype).itemsize)
    Rp = _round_up(R, rb)
    if Rp != R or Hpad != H:
        x3 = jnp.pad(x3, ((0, Rp - R), (0, Hpad - H), (0, 0)),
                     constant_values=_lowest(x3.dtype))
    kern = functools.partial(_adaptive_max_kernel, kw=kw, h_windows=h_windows)
    out = pl.pallas_call(
        kern,
        out_shape=jax.ShapeDtypeStruct((Rp, HO, WO), out_dtype),
        grid=(Rp // rb,),
        in_specs=[pl.BlockSpec((rb, Hpad, W), lambda i: (i, 0, 0)),
                  pl.BlockSpec((kw, W, WO), lambda i: (0, 0, 0))],
        out_specs=pl.BlockSpec((rb, HO, WO), lambda i: (i, 0, 0)),
        compiler_params=_compiler_params(),
    )(x3, selw)
    return out[:R] if Rp != R else out


# --------------------------------------------------------------------------
# PoolCell (Pallas equivalent of the PyTorch module)
# --------------------------------------------------------------------------
class PoolCell:
    def __init__(self, cell_info):
        self.cell_info = dict(cell_info)
        self.mode = self.cell_info['mode']
        if self.mode not in ('avg', 'max', 'maxun', 'adapt_avg', 'adapt_max'):
            raise ValueError('model mode not supported')

    def _dispatch_avg(self, x, ah, aw, HO, WO):
        N, C, H, W = x.shape
        weight_bytes = H * W * HO * WO * 4
        row_bytes = H * W * 4
        if weight_bytes <= _KRON_WEIGHT_LIMIT and row_bytes <= _KRON_ROW_LIMIT:
            wk = _kron_weight(ah, aw)                       # (H*W, HO*WO)
            xf = x.reshape(N * C, H * W)
            out = _run_kron(xf, wk, x.dtype)
            return out.reshape(N, C, HO, WO)
        # separable fallback for large spatial extents
        rw = jnp.asarray(np.ascontiguousarray(aw.T))        # (W, WO)
        lh = jnp.asarray(ah)                                # (HO, H)
        x3 = x.reshape(N * C, H, W)
        out = _run_sep(x3, rw, lh, x.dtype, HO, WO)
        return out.reshape(N, C, HO, WO)

    def __call__(self, x):
        ci = self.cell_info
        N, C, H, W = x.shape

        if self.mode == 'avg':
            k = _pair(ci['kernel_size'])
            s = k if ci.get('stride') is None else _pair(ci['stride'])
            p = _pair(ci.get('padding', 0))
            ceil_mode = bool(ci.get('ceil_mode', False))
            cip = bool(ci.get('count_include_pad', True))
            HO = _pool_out_size(H, k[0], s[0], p[0], 1, ceil_mode)
            WO = _pool_out_size(W, k[1], s[1], p[1], 1, ceil_mode)
            ah = _avg_axis_weights(H, k[0], s[0], p[0], HO, cip)
            aw = _avg_axis_weights(W, k[1], s[1], p[1], WO, cip)
            return self._dispatch_avg(x, ah, aw, HO, WO)

        if self.mode == 'adapt_avg':
            HO, WO = _out_hw_from_output_size(ci['output_size'], H, W)
            ah = _adaptive_axis_weights(H, HO)
            aw = _adaptive_axis_weights(W, WO)
            return self._dispatch_avg(x, ah, aw, HO, WO)

        if self.mode == 'max':
            if ci.get('return_indices'):
                # TODO(synk): MaxPool2d(return_indices=True) argmax output not implemented.
                raise NotImplementedError('return_indices=True not supported')
            k = _pair(ci['kernel_size'])
            s = k if ci.get('stride') is None else _pair(ci['stride'])
            p = _pair(ci.get('padding', 0))
            d = _pair(ci.get('dilation', 1))
            ceil_mode = bool(ci.get('ceil_mode', False))
            HO = _pool_out_size(H, k[0], s[0], p[0], d[0], ceil_mode)
            WO = _pool_out_size(W, k[1], s[1], p[1], d[1], ceil_mode)
            ho_pad = _round_up(HO, 8)
            # physical pad (finite lowest) so every strided tap / W-selector index
            # (including the ho_pad-HO dummy rows) stays in range
            hp_needed = (ho_pad - 1) * s[0] + (k[0] - 1) * d[0] + 1
            wp_needed = (WO - 1) * s[1] + (k[1] - 1) * d[1] + 1
            eh = max(0, hp_needed - (H + 2 * p[0]))
            ew = max(0, wp_needed - (W + 2 * p[1]))
            x3 = x.reshape(N * C, H, W)
            if p[0] or p[1] or eh or ew:
                x3 = jnp.pad(x3, ((0, 0), (p[0], p[0] + eh), (p[1], p[1] + ew)),
                             constant_values=_lowest(x.dtype))
            Hp, Wp = H + 2 * p[0] + eh, W + 2 * p[1] + ew
            selw = _max_selw(Wp, WO, k[1], s[1], d[1])
            out = _run_max(x3, selw, x.dtype, HO, WO,
                           kh=k[0], kw=k[1], sh=s[0], dh=d[0], ho_pad=ho_pad)
            return out.reshape(N, C, HO, WO)

        if self.mode == 'adapt_max':
            HO, WO = _out_hw_from_output_size(ci['output_size'], H, W)
            selw, kw = _adaptive_selw(W, WO)
            h_windows = _adaptive_windows(H, HO)
            x3 = x.reshape(N * C, H, W)
            out = _run_adaptive_max(x3, selw, x.dtype, HO, WO, kw, h_windows)
            return out.reshape(N, C, HO, WO)

        # TODO(synk): 'maxun' (MaxUnpool2d) needs the companion argmax indices and
        # a scatter; no clean Pallas equivalent implemented here.
        raise NotImplementedError('maxun (MaxUnpool2d) is not implemented')


# --------------------------------------------------------------------------
# numpy references (correctness check only) -- mirror PyTorch semantics
# --------------------------------------------------------------------------
def _ref_avg_pool(x, k, s, p, ceil_mode, count_include_pad):
    N, C, H, W = x.shape
    HO = _pool_out_size(H, k[0], s[0], p[0], 1, ceil_mode)
    WO = _pool_out_size(W, k[1], s[1], p[1], 1, ceil_mode)
    out = np.zeros((N, C, HO, WO), np.float32)
    for oh in range(HO):
        hstart = oh * s[0] - p[0]
        hend = hstart + k[0]
        ph = min(hend, H + p[0]) - hstart
        hs, he = max(hstart, 0), min(hend, H)
        for ow in range(WO):
            wstart = ow * s[1] - p[1]
            wend = wstart + k[1]
            pw = min(wend, W + p[1]) - wstart
            ws, we = max(wstart, 0), min(wend, W)
            acc = x[:, :, hs:he, ws:we].sum((2, 3))
            div = ph * pw if count_include_pad else max((he - hs) * (we - ws), 1)
            out[:, :, oh, ow] = acc / div
    return out


def _ref_max_pool(x, k, s, p, d, ceil_mode):
    N, C, H, W = x.shape
    HO = _pool_out_size(H, k[0], s[0], p[0], d[0], ceil_mode)
    WO = _pool_out_size(W, k[1], s[1], p[1], d[1], ceil_mode)
    out = np.zeros((N, C, HO, WO), np.float32)
    for oh in range(HO):
        for ow in range(WO):
            vals = []
            for kh in range(k[0]):
                ih = oh * s[0] - p[0] + kh * d[0]
                if ih < 0 or ih >= H:
                    continue
                for kw in range(k[1]):
                    iw = ow * s[1] - p[1] + kw * d[1]
                    if iw < 0 or iw >= W:
                        continue
                    vals.append(x[:, :, ih, iw])
            out[:, :, oh, ow] = np.max(np.stack(vals, 0), 0)
    return out


def _ref_adaptive(x, HO, WO, op):
    N, C, H, W = x.shape
    out = np.zeros((N, C, HO, WO), np.float32)
    for oh in range(HO):
        hs, he = (oh * H) // HO, -(-((oh + 1) * H) // HO)
        for ow in range(WO):
            ws, we = (ow * W) // WO, -(-((ow + 1) * W) // WO)
            win = x[:, :, hs:he, ws:we]
            out[:, :, oh, ow] = win.mean((2, 3)) if op == 'avg' else win.max((2, 3))
    return out


# --------------------------------------------------------------------------
if __name__ == "__main__":
    key = jax.random.PRNGKey(0)
    x = jax.random.normal(key, (2, 4, 16, 16), dtype=jnp.float32)
    xn = np.asarray(x)
    tol = dict(rtol=1e-4, atol=1e-4)

    # 1) avg pool, k=2 s=2 p=0                              (Kronecker path)
    cell = PoolCell({'mode': 'avg', 'kernel_size': 2, 'stride': 2, 'padding': 0,
                     'ceil_mode': False, 'count_include_pad': True})
    y = jax.block_until_ready(cell(x))
    np.testing.assert_allclose(np.asarray(y),
                               _ref_avg_pool(xn, (2, 2), (2, 2), (0, 0), False, True), **tol)

    # 2) avg pool, k=3 s=2 p=1, ceil_mode, count_include_pad=False
    cell = PoolCell({'mode': 'avg', 'kernel_size': 3, 'stride': 2, 'padding': 1,
                     'ceil_mode': True, 'count_include_pad': False})
    y = jax.block_until_ready(cell(x))
    np.testing.assert_allclose(np.asarray(y),
                               _ref_avg_pool(xn, (3, 3), (2, 2), (1, 1), True, False), **tol)

    # 3) max pool, k=3 s=2 p=1                              (strided H taps)
    cell = PoolCell({'mode': 'max', 'kernel_size': 3, 'stride': 2, 'padding': 1,
                     'dilation': 1, 'return_indices': False, 'ceil_mode': False})
    y = jax.block_until_ready(cell(x))
    np.testing.assert_allclose(np.asarray(y),
                               _ref_max_pool(xn, (3, 3), (2, 2), (1, 1), (1, 1), False), **tol)

    # 4) max pool, k=2 s=2 p=1 dilation=2, ceil_mode
    cell = PoolCell({'mode': 'max', 'kernel_size': 2, 'stride': 2, 'padding': 1,
                     'dilation': 2, 'return_indices': False, 'ceil_mode': True})
    y = jax.block_until_ready(cell(x))
    np.testing.assert_allclose(np.asarray(y),
                               _ref_max_pool(xn, (2, 2), (2, 2), (1, 1), (2, 2), True), **tol)

    # 5) adaptive avg pool, output_size (6, 6)              (Kronecker path)
    cell = PoolCell({'mode': 'adapt_avg', 'output_size': (6, 6)})
    y = jax.block_until_ready(cell(x))
    np.testing.assert_allclose(np.asarray(y), _ref_adaptive(xn, 6, 6, 'avg'), **tol)

    # 6) adaptive max pool, output_size (5, 6)
    cell = PoolCell({'mode': 'adapt_max', 'output_size': (5, 6)})
    y = jax.block_until_ready(cell(x))
    np.testing.assert_allclose(np.asarray(y), _ref_adaptive(xn, 5, 6, 'max'), **tol)

    # 7) avg pool on a larger plane -> exercises the separable fallback
    x2 = jax.random.normal(jax.random.PRNGKey(1), (1, 8, 64, 48), dtype=jnp.float32)
    x2n = np.asarray(x2)
    cell = PoolCell({'mode': 'avg', 'kernel_size': 2, 'stride': 2, 'padding': 0,
                     'ceil_mode': False, 'count_include_pad': True})
    y = jax.block_until_ready(cell(x2))
    np.testing.assert_allclose(np.asarray(y),
                               _ref_avg_pool(x2n, (2, 2), (2, 2), (0, 0), False, True), **tol)

    print("KERNEL_OK")
</pallas_src>

<mosaic_0001>
module attributes {stable_mosaic.version = 11 : i64} {
  func.func @_avg_kron_kernel(%arg0: i32, %arg1: memref<8x256xf32, #tpu.memory_space<vmem>>, %arg2: memref<256x64xf32, #tpu.memory_space<vmem>>, %arg3: memref<8x64xf32, #tpu.memory_space<vmem>>) attributes {dimension_semantics = [#tpu.dimension_semantics<parallel>], iteration_bounds = array<i64: 1>, scalar_prefetch = 0 : i64, scratch_operands = 0 : i64, tpu.core_type = #tpu.core_type<tc>, window_params = [{transform_indices = @transform_0, window_bounds = array<i64: 8, 256>}, {pipeline_mode = #tpu.pipeline_mode<synchronous>, transform_indices = @transform_1, window_bounds = array<i64: 256, 64>}, {transform_indices = @transform_2, window_bounds = array<i64: 8, 64>}]} {
    %c0 = arith.constant 0 : index
    %c0_0 = arith.constant 0 : index
    %0 = vector.load %arg1[%c0, %c0_0] : memref<8x256xf32, #tpu.memory_space<vmem>>, vector<8x256xf32>
    %c0_1 = arith.constant 0 : index
    %c0_2 = arith.constant 0 : index
    %1 = vector.load %arg2[%c0_1, %c0_2] : memref<256x64xf32, #tpu.memory_space<vmem>>, vector<256x64xf32>
    %cst = arith.constant dense<0.000000e+00> : vector<8x64xf32>
    %2 = tpu.matmul %0, %1, %cst {dimension_numbers = #tpu.dot_dimension_numbers<[1], [0], [0], [1], [0, 0, 1, 1], [], []>} : vector<8x256xf32>, vector<256x64xf32>, vector<8x64xf32> -> vector<8x64xf32>
    %c0_3 = arith.constant 0 : index
    %c0_4 = arith.constant 0 : index
    %3 = vector.load %arg3[%c0_3, %c0_4] : memref<8x64xf32, #tpu.memory_space<vmem>>, vector<8x64xf32>
    tpu.vector_store %arg3[%c0_3, %c0_4], %2 {strides = array<i32>} : memref<8x64xf32, #tpu.memory_space<vmem>>, vector<8x64xf32>,
    return
  }
  func.func @transform_0(%arg0: i32) -> (i32, i32) {
    %c0_i32 = arith.constant 0 : i32
    %c0_i32_0 = arith.constant 0 : i32
    return %arg0, %c0_i32 : i32, i32
  }
  func.func @transform_1(%arg0: i32) -> (i32, i32) {
    %c0_i32 = arith.constant 0 : i32
    %c0_i32_0 = arith.constant 0 : i32
    %c0_i32_1 = arith.constant 0 : i32
    return %c0_i32, %c0_i32_0 : i32, i32
  }
  func.func @transform_2(%arg0: i32) -> (i32, i32) {
    %c0_i32 = arith.constant 0 : i32
    %c0_i32_0 = arith.constant 0 : i32
    return %arg0, %c0_i32 : i32, i32
  }
}

</mosaic_0001>

<bundles_post_ra>
// kernel: tpu_custom_call.1
= control target key start
LH: loop header
LB: loop body
LE: loop exit
PB: predicated region body
PF: predicated region fallthrough
CT: control target
= control target key end

     0   :  { %s354_s0 = inlined_call_operand.vmem [shape: f32[8,256], index: 0, kind: input, shape index: {}]   ;;  %s355_s1 = inlined_call_operand.vmem [shape: f32[256,64], index: 1, kind: input, shape index: {}]   ;;  %s356_s2 = inlined_call_operand.hbm [shape: f32[8,64], index: 2, kind: output, shape index: {}]  }
   0x1   :  { %v30_v0 = vld [vmem:[%s355_s1 + $0x80] sm:$0xff]  ;;  %v31_v1 = vld [vmem:[%s355_s1 + $0x88] sm:$0xff]  ;;  %v32_v5 = vld [vmem:[%s355_s1 + $0x90] sm:$0xff] }
   0x2   :  { %v14_v2 = vld [vmem:[%s355_s1] sm:$0xff]  ;;  %v167_v3 = vpack.c.bf16 %v31_v1, %v30_v0  ;;  %v15_v4 = vld [vmem:[%s355_s1 + $0x8] sm:$0xff]  ;;  %v33_v6 = vld [vmem:[%s355_s1 + $0x98] sm:$0xff] }
   0x3   :  { %v169_v7 = vpack.c.bf16 %v15_v4, %v14_v2  ;;  %v171_v8 = vpack.c.bf16 %v33_v6, %v32_v5  ;;  %v16_v9 = vld [vmem:[%s355_s1 + $0x10] sm:$0xff]  ;;  %v17_v10 = vld [vmem:[%s355_s1 + $0x18] sm:$0xff]  ;;  %v34_v11 = vld [vmem:[%s355_s1 + $0xa0] sm:$0xff] }
   0x4   :  { %168 = vmatprep.subr.bf16.mxu0 %v167_v3  ;;  %v35_v12 = vld [vmem:[%s355_s1 + $0xa8] sm:$0xff]  ;;  %v173_v13 = vpack.c.bf16 %v17_v10, %v16_v9  ;;  %v18_v15 = vld [vmem:[%s355_s1 + $0x20] sm:$0xff]  ;;  %v36_v17 = vld [vmem:[%s355_s1 + $0xb0] sm:$0xff] }
   0x5   :  { %170 = vmatpush3.bf16.msra.mxu0 %v169_v7  ;;  %v175_v14 = vpack.c.bf16 %v35_v12, %v34_v11  ;;  %v19_v16 = vld [vmem:[%s355_s1 + $0x28] sm:$0xff]  ;;  %v37_v18 = vld [vmem:[%s355_s1 + $0xb8] sm:$0xff]  ;;  %v20_v21 = vld [vmem:[%s355_s1 + $0x30] sm:$0xff] }
   0x6   :  { %172 = vmatprep.subr.bf16.mxu0 %v171_v8  ;;  %v177_v19 = vpack.c.bf16 %v19_v16, %v18_v15  ;;  %v179_v20 = vpack.c.bf16 %v37_v18, %v36_v17  ;;  %v21_v22 = vld [vmem:[%s355_s1 + $0x38] sm:$0xff]  ;;  %v38_v23 = vld [vmem:[%s355_s1 + $0xc0] sm:$0xff]  ;;  %v39_v24 = vld [vmem:[%s355_s1 + $0xc8] sm:$0xff] }
   0x7   :  { %v13_v25 = vld [vmem:[%s354_s0 + $0x8] sm:$0xff] }
   0x8   :  { %110 = vmatprep.mubr.f32.mxu0 %v13_v25 }
   0x9   :  { %174 = vmatpush3.bf16.msra.mxu0 %v173_v13 }
   0xa   :  { %176 = vmatprep.subr.bf16.mxu0 %v175_v14 }
   0xb   :  { %7 = vsyncpa [#allocation3], 0  ;;  %v181_v26 = vpack.c.bf16 %v21_v22, %v20_v21  ;;  %v183_v27 = vpack.c.bf16 %v39_v24, %v38_v23  ;;  %v22_v28 = vld [vmem:[%s355_s1 + $0x40] sm:$0xff]  ;;  %v23_v29 = vld [vmem:[%s355_s1 + $0x48] sm:$0xff]  ;;  %s224_s21 = smov [#allocation2]   ;;  %vm116_vm0 = vcmask 523264  }
   0xc   :  { %v40_v30 = vld [vmem:[%s355_s1 + $0xd0] sm:$0xff]  ;;  %v41_v31 = vld [vmem:[%s355_s1 + $0xd8] sm:$0xff]  ;;  %v185_v32 = vpack.c.bf16 %v23_v29, %v22_v28  ;;  %v42_v36 = vld [vmem:[%s355_s1 + $0xe0] sm:$0xff]  ;;  %s124_s22 = sshll.u32 %s224_s21, 4  ;;  %s125_s22 = int_to_ptr.vmem [resolvable:$true] %s124_s22 }
   0xd   :  { %178 = vmatpush3.bf16.msra.mxu0 %v177_v19  ;;  %v187_v33 = vpack.c.bf16 %v41_v31, %v40_v30  ;;  %v24_v34 = vld [vmem:[%s355_s1 + $0x50] sm:$0xff]  ;;  %v25_v35 = vld [vmem:[%s355_s1 + $0x58] sm:$0xff]  ;;  %v43_v37 = vld [vmem:[%s355_s1 + $0xe8] sm:$0xff]  ;;  %s200_s23 = scalar_lea.vmem %s125_s22, 128  ;;  %p205_p1 = scmp.lt.s32.totalorder %s125_s22, %s125_s22 }
   0xe   :  { %180 = vmatprep.subr.bf16.mxu0 %v179_v20  ;;  %v189_v38 = vpack.c.bf16 %v25_v35, %v24_v34  ;;  %v191_v39 = vpack.c.bf16 %v43_v37, %v42_v36  ;;  %v26_v40 = vld [vmem:[%s355_s1 + $0x60] sm:$0xff]  ;;  %v27_v41 = vld [vmem:[%s355_s1 + $0x68] sm:$0xff]  ;;  %v44_v42 = vld [vmem:[%s355_s1 + $0xf0] sm:$0xff]  ;;  %p201_p0 = scmp.ne.s32.totalorder %s125_s22, %s200_s23  ;;  %p206_p2 = scmp.lt.s32.totalorder %s200_s23, %s200_s23 }
   0xf   :  { %v45_v43 = vld [vmem:[%s355_s1 + $0xf8] sm:$0xff]  ;;  %v193_v44 = vpack.c.bf16 %v27_v41, %v26_v40  ;;  %v28_v46 = vld [vmem:[%s355_s1 + $0x70] sm:$0xff]  ;;  %v12_v49 = vld [vmem:[%s354_s0] sm:$0xff] }
  0x10   :  { %v195_v45 = vpack.c.bf16 %v45_v43, %v44_v42  ;;  %v29_v47 = vld [vmem:[%s355_s1 + $0x78] sm:$0xff]  ;;  %p207_p3 = por %p206_p2, %p205_p1 }
  0x11   :  { %182 = vmatpush3.bf16.msra.mxu0 %v181_v26  ;;  %v197_v48 = vpack.c.bf16 %v29_v47, %v28_v46 }
  0x12   :  { %184 = vmatprep.subr.bf16.mxu0 %v183_v27  ;;  %p208_p4 = pnand %p207_p3, %p201_p0 }
  0x15   :  { %186 = vmatpush3.bf16.msra.mxu0 %v185_v32 }
  0x16   :  { %188 = vmatprep.subr.bf16.mxu0 %v187_v33 }
  0x19   :  { %190 = vmatpush3.bf16.msra.mxu0 %v189_v38 }
  0x1a   :  { %192 = vmatprep.subr.bf16.mxu0 %v191_v39 }
  0x1d   :  { %194 = vmatpush3.bf16.msra.mxu0 %v193_v44 }
  0x1e   :  { %196 = vmatprep.subr.bf16.mxu0 %v195_v45 }
  0x21   :  { %198 = vmatpush3.bf16.msra.mxu0 %v197_v48 }
  0x24   :  { %111 = vmatmul.mubr.f32.vlgmr.msra.gmra.mrb[0].mxu0 %v12_v49 }
  0xf7   :  { %v164_v50 = vpop.f32.mrb[0].mxu0 }
  0xf8   :  { %v165_v51 = vpop.f32.mrb[1].mxu0 }
  0xf9   :  { %v166_v52 = vadd.f32 %v165_v51, %v164_v50 }
  0xfb   :  { %117 = vst.msk [vmem:[#allocation2] sm:$0xff] %vm116_vm0, %v166_v52 }
  0xfc   :  { %211 = shalt.err (!%p208_p4)
}
  0xfd   :  { %s212_s0 = scalar_lea.hbm %s356_s2, 128 }
  0xfe   :  { %p213_p5 = scmp.ne.s32.totalorder %s356_s2, %s212_s0  ;;  %p216_p6 = scmp.lt.u32.totalorder %s212_s0, %s356_s2 }
 0x100   :  { %p218_p7 = pnand %p216_p6, %p213_p5 }
 0x102   :  { %221 = shalt.err (!%p218_p7)
}
 0x103   :  { %127 = dma.vmem_to_hbm [thread:$0]  %s125_s22, 128, %s356_s2, [#allocation3]  }
 0x104   :  { %222 = dma.done.wait [#allocation3], 128  }
 0x105   :  { %223 = vsyncadd [#allocation3], 4294967168 }
 0x106   :  { %131 = vsyncpa [#allocation3], 1 }

</bundles_post_ra>
